<compile_context>
chip_gen: v7x
topology: tpu7x:2x2x1
jax: 0.10.0
libtpu: 0.0.40
codegen_flags: <defaults>
</compile_context>

<pallas_src>
import jax
import jax.numpy as jnp
from jax.experimental import pallas as pl
from jax.experimental.pallas import tpu as pltpu

LANE = 128


def _outconv_kernel(x_ref, w_ref, b_ref, o_ref):
    """One (batch-block, spatial-block) grid step.

    x_ref: (Bn, C_in,  S, 128)  VMEM  activations (dense sublane*lane tiles)
    w_ref: (C_out, C_in)        SMEM  1x1 conv weights (f32 scalars)
    b_ref: (C_out,)             SMEM  bias (f32 scalars)
    o_ref: (Bn, C_out, S, 128)  VMEM  output activations
    """
    bn = x_ref.shape[0]
    c_in = x_ref.shape[1]
    c_out = o_ref.shape[1]

    for b in range(bn):                               # static, fully unrolled
        accs = [None] * c_out
        for ci in range(c_in):                        # ci-outer: load each x slab once
            x_ci = x_ref[b, ci].astype(jnp.float32)   # (S, 128) dense tile
            for co in range(c_out):
                contrib = w_ref[co, ci] * x_ci        # VPU scalar*tile FMA
                accs[co] = contrib if accs[co] is None else accs[co] + contrib
        for co in range(c_out):
            # Bias fused with the final cast; store each channel directly
            # (no concatenate / extra full-tile temp).
            o_ref[b, co] = (accs[co] + b_ref[co]).astype(o_ref.dtype)


def _pick_sublane_tile(r, c_in, c_out, itemsize, n_batch):
    """Spatial tile S (in 8-sublane-aligned rows of 128 lanes).

    Sized so the double-buffered x+y tiles stay around ~12 MiB -- safe against
    v7x's 64 MiB physical VMEM / 32 MiB scoped default and v5e's defaults once
    vmem_limit_bytes is raised to 32 MiB.
    """
    budget = 12 << 20                                 # double-buffered tile bytes
    s_cap = budget // (2 * (c_in + c_out) * LANE * itemsize)
    s_cap = max(8, (s_cap // 8) * 8)
    if r <= s_cap:
        if n_batch == 1 and r >= 16:
            # Split the spatial axis so the grid has >= 2 programs
            # (megacore sharding on v7x + DMA/compute overlap).
            return max(8, (r // 2) // 8 * 8)
        return r                                      # full extent: always legal
    return s_cap


def _pick_batch_block(n, n_s, per_row_bytes):
    """Block batch rows together so each grid step moves >= ~1 MiB, while
    keeping at least 2 grid programs whenever N >= 2."""
    target = 1 << 20
    bn = max(1, min(n, target // max(per_row_bytes, 1), 8))
    if n_s == 1:
        bn = min(bn, max(1, n // 2))
    while n % bn:                                     # keep batch blocks exact
        bn -= 1
    return bn


def outconv_pallas(x_nchw, weight, bias):
    """1x1 Conv2d forward (PyTorch OutConv), native NCHW layout.

    x_nchw: (N, C_in, H, W)
    weight: (C_out, C_in, 1, 1)   -- PyTorch Conv2d weight layout
    bias:   (C_out,)
    returns (N, C_out, H, W)
    """
    N, C_in, H, W = x_nchw.shape
    C_out = weight.shape[0]
    HW = H * W
    itemsize = x_nchw.dtype.itemsize

    # Layout plumbing: contiguous reshape (+ optional lane pad), no transpose.
    hw_pad = ((HW + LANE - 1) // LANE) * LANE
    x3 = x_nchw.reshape(N, C_in, HW)
    if hw_pad != HW:
        x3 = jnp.pad(x3, ((0, 0), (0, 0), (0, hw_pad - HW)))
    R = hw_pad // LANE
    x4 = x3.reshape(N, C_in, R, LANE)                 # sublane-dense spatial layout

    w2 = weight.reshape(C_out, C_in).astype(jnp.float32)   # tiny -> SMEM scalars
    b1 = bias.reshape(C_out).astype(jnp.float32)

    S = _pick_sublane_tile(R, C_in, C_out, itemsize, N)
    n_s = pl.cdiv(R, S)
    Bn = _pick_batch_block(N, n_s, (C_in + C_out) * S * LANE * itemsize)
    n_b = N // Bn

    y4 = pl.pallas_call(
        _outconv_kernel,
        out_shape=jax.ShapeDtypeStruct((N, C_out, R, LANE), x_nchw.dtype),
        grid=(n_b, n_s),
        in_specs=[
            pl.BlockSpec((Bn, C_in, S, LANE), lambda n, s: (n, 0, s, 0)),
            pl.BlockSpec(memory_space=pltpu.MemorySpace.SMEM),   # weights, whole
            pl.BlockSpec(memory_space=pltpu.MemorySpace.SMEM),   # bias, whole
        ],
        out_specs=pl.BlockSpec((Bn, C_out, S, LANE), lambda n, s: (n, 0, s, 0)),
        compiler_params=pltpu.CompilerParams(
            dimension_semantics=("parallel", "parallel"),
            vmem_limit_bytes=32 << 20,
        ),
        cost_estimate=pl.CostEstimate(
            flops=2 * N * HW * C_in * C_out,
            transcendentals=0,
            bytes_accessed=(N * C_in * HW + N * C_out * HW) * itemsize
            + (C_out * C_in + C_out) * 4,
        ),
    )(x4, w2, b1)

    y3 = y4.reshape(N, C_out, hw_pad)
    if hw_pad != HW:
        y3 = y3[:, :, :HW]
    return y3.reshape(N, C_out, H, W)


def outconv_reference(x_nchw, weight, bias):
    # Pure-JAX reference: lax conv with 1x1 kernel.
    return jax.lax.conv_general_dilated(
        x_nchw, weight, window_strides=(1, 1), padding="VALID",
        dimension_numbers=("NCHW", "OIHW", "NCHW"),
    ) + bias.reshape(1, -1, 1, 1)


if __name__ == "__main__":
    key = jax.random.PRNGKey(0)
    k_x, k_w, k_b, k_x2 = jax.random.split(key, 4)

    N, C_in, C_out, H, W = 2, 4, 3, 16, 16

    x = jax.random.normal(k_x, (N, C_in, H, W), dtype=jnp.float32)
    # Conv2d(in_channels, out_channels, kernel_size=1) parameter shapes.
    weight = jax.random.normal(k_w, (C_out, C_in, 1, 1), dtype=jnp.float32) * 0.1
    bias = jax.random.normal(k_b, (C_out,), dtype=jnp.float32) * 0.1

    y = outconv_pallas(x, weight, bias)
    y = jax.block_until_ready(y)
    y_ref = outconv_reference(x, weight, bias)
    assert y.shape == (N, C_out, H, W)
    assert jnp.allclose(y, y_ref, atol=1e-5, rtol=1e-5)

    # Second check: HW not a multiple of 128 exercises the lane-pad path.
    x2 = jax.random.normal(k_x2, (1, C_in, 5, 7), dtype=jnp.float32)
    y2 = jax.block_until_ready(outconv_pallas(x2, weight, bias))
    y2_ref = outconv_reference(x2, weight, bias)
    assert y2.shape == (1, C_out, 5, 7)
    assert jnp.allclose(y2, y2_ref, atol=1e-5, rtol=1e-5)

    print("KERNEL_OK")
</pallas_src>

<mosaic_0001>
module attributes {stable_mosaic.version = 11 : i64} {
  func.func @_outconv_kernel(%arg0: i32, %arg1: i32, %arg2: memref<1x4x2x128xf32, #tpu.memory_space<vmem>>, %arg3: memref<3x4xf32, #tpu.memory_space<smem>>, %arg4: memref<3xf32, #tpu.memory_space<smem>>, %arg5: memref<1x3x2x128xf32, #tpu.memory_space<vmem>>) attributes {dimension_semantics = [#tpu.dimension_semantics<parallel>, #tpu.dimension_semantics<parallel>], iteration_bounds = array<i64: 2, 1>, scalar_prefetch = 0 : i64, scratch_operands = 0 : i64, tpu.core_type = #tpu.core_type<tc>, window_params = [{transform_indices = @transform_0, window_bounds = array<i64: 1, 4, 2, 128>}, {transform_indices = @transform_1, window_bounds = array<i64: 3, 4>}, {transform_indices = @transform_2, window_bounds = array<i64: 3>}, {transform_indices = @transform_3, window_bounds = array<i64: 1, 3, 2, 128>}]} {
    %c0 = arith.constant 0 : index
    %c0_0 = arith.constant 0 : index
    %c0_1 = arith.constant 0 : index
    %c0_2 = arith.constant 0 : index
    %0 = vector.load %arg2[%c0, %c0_0, %c0_1, %c0_2] : memref<1x4x2x128xf32, #tpu.memory_space<vmem>>, vector<1x1x2x128xf32>
    %1 = vector.shape_cast %0 : vector<1x1x2x128xf32> to vector<2x128xf32>
    %c0_3 = arith.constant 0 : index
    %c0_4 = arith.constant 0 : index
    %2 = memref.load %arg3[%c0_3, %c0_4] : memref<3x4xf32, #tpu.memory_space<smem>>
    %3 = vector.broadcast %2 : f32 to vector<2x128xf32>
    %4 = arith.mulf %3, %1 : vector<2x128xf32>
    %c1 = arith.constant 1 : index
    %c0_5 = arith.constant 0 : index
    %5 = memref.load %arg3[%c1, %c0_5] : memref<3x4xf32, #tpu.memory_space<smem>>
    %6 = vector.broadcast %5 : f32 to vector<2x128xf32>
    %7 = arith.mulf %6, %1 : vector<2x128xf32>
    %c2 = arith.constant 2 : index
    %c0_6 = arith.constant 0 : index
    %8 = memref.load %arg3[%c2, %c0_6] : memref<3x4xf32, #tpu.memory_space<smem>>
    %9 = vector.broadcast %8 : f32 to vector<2x128xf32>
    %10 = arith.mulf %9, %1 : vector<2x128xf32>
    %c0_7 = arith.constant 0 : index
    %c1_8 = arith.constant 1 : index
    %c0_9 = arith.constant 0 : index
    %c0_10 = arith.constant 0 : index
    %11 = vector.load %arg2[%c0_7, %c1_8, %c0_9, %c0_10] : memref<1x4x2x128xf32, #tpu.memory_space<vmem>>, vector<1x1x2x128xf32>
    %12 = vector.shape_cast %11 : vector<1x1x2x128xf32> to vector<2x128xf32>
    %c0_11 = arith.constant 0 : index
    %c1_12 = arith.constant 1 : index
    %13 = memref.load %arg3[%c0_11, %c1_12] : memref<3x4xf32, #tpu.memory_space<smem>>
    %14 = vector.broadcast %13 : f32 to vector<2x128xf32>
    %15 = arith.mulf %14, %12 : vector<2x128xf32>
    %16 = arith.addf %4, %15 : vector<2x128xf32>
    %c1_13 = arith.constant 1 : index
    %c1_14 = arith.constant 1 : index
    %17 = memref.load %arg3[%c1_13, %c1_14] : memref<3x4xf32, #tpu.memory_space<smem>>
    %18 = vector.broadcast %17 : f32 to vector<2x128xf32>
    %19 = arith.mulf %18, %12 : vector<2x128xf32>
    %20 = arith.addf %7, %19 : vector<2x128xf32>
    %c2_15 = arith.constant 2 : index
    %c1_16 = arith.constant 1 : index
    %21 = memref.load %arg3[%c2_15, %c1_16] : memref<3x4xf32, #tpu.memory_space<smem>>
    %22 = vector.broadcast %21 : f32 to vector<2x128xf32>
    %23 = arith.mulf %22, %12 : vector<2x128xf32>
    %24 = arith.addf %10, %23 : vector<2x128xf32>
    %c0_17 = arith.constant 0 : index
    %c2_18 = arith.constant 2 : index
    %c0_19 = arith.constant 0 : index
    %c0_20 = arith.constant 0 : index
    %25 = vector.load %arg2[%c0_17, %c2_18, %c0_19, %c0_20] : memref<1x4x2x128xf32, #tpu.memory_space<vmem>>, vector<1x1x2x128xf32>
    %26 = vector.shape_cast %25 : vector<1x1x2x128xf32> to vector<2x128xf32>
    %c0_21 = arith.constant 0 : index
    %c2_22 = arith.constant 2 : index
    %27 = memref.load %arg3[%c0_21, %c2_22] : memref<3x4xf32, #tpu.memory_space<smem>>
    %28 = vector.broadcast %27 : f32 to vector<2x128xf32>
    %29 = arith.mulf %28, %26 : vector<2x128xf32>
    %30 = arith.addf %16, %29 : vector<2x128xf32>
    %c1_23 = arith.constant 1 : index
    %c2_24 = arith.constant 2 : index
    %31 = memref.load %arg3[%c1_23, %c2_24] : memref<3x4xf32, #tpu.memory_space<smem>>
    %32 = vector.broadcast %31 : f32 to vector<2x128xf32>
    %33 = arith.mulf %32, %26 : vector<2x128xf32>
    %34 = arith.addf %20, %33 : vector<2x128xf32>
    %c2_25 = arith.constant 2 : index
    %c2_26 = arith.constant 2 : index
    %35 = memref.load %arg3[%c2_25, %c2_26] : memref<3x4xf32, #tpu.memory_space<smem>>
    %36 = vector.broadcast %35 : f32 to vector<2x128xf32>
    %37 = arith.mulf %36, %26 : vector<2x128xf32>
    %38 = arith.addf %24, %37 : vector<2x128xf32>
    %c0_27 = arith.constant 0 : index
    %c3 = arith.constant 3 : index
    %c0_28 = arith.constant 0 : index
    %c0_29 = arith.constant 0 : index
    %39 = vector.load %arg2[%c0_27, %c3, %c0_28, %c0_29] : memref<1x4x2x128xf32, #tpu.memory_space<vmem>>, vector<1x1x2x128xf32>
    %40 = vector.shape_cast %39 : vector<1x1x2x128xf32> to vector<2x128xf32>
    %c0_30 = arith.constant 0 : index
    %c3_31 = arith.constant 3 : index
    %41 = memref.load %arg3[%c0_30, %c3_31] : memref<3x4xf32, #tpu.memory_space<smem>>
    %42 = vector.broadcast %41 : f32 to vector<2x128xf32>
    %43 = arith.mulf %42, %40 : vector<2x128xf32>
    %44 = arith.addf %30, %43 : vector<2x128xf32>
    %c1_32 = arith.constant 1 : index
    %c3_33 = arith.constant 3 : index
    %45 = memref.load %arg3[%c1_32, %c3_33] : memref<3x4xf32, #tpu.memory_space<smem>>
    %46 = vector.broadcast %45 : f32 to vector<2x128xf32>
    %47 = arith.mulf %46, %40 : vector<2x128xf32>
    %48 = arith.addf %34, %47 : vector<2x128xf32>
    %c2_34 = arith.constant 2 : index
    %c3_35 = arith.constant 3 : index
    %49 = memref.load %arg3[%c2_34, %c3_35] : memref<3x4xf32, #tpu.memory_space<smem>>
    %50 = vector.broadcast %49 : f32 to vector<2x128xf32>
    %51 = arith.mulf %50, %40 : vector<2x128xf32>
    %52 = arith.addf %38, %51 : vector<2x128xf32>
    %c0_36 = arith.constant 0 : index
    %53 = memref.load %arg4[%c0_36] : memref<3xf32, #tpu.memory_space<smem>>
    %54 = vector.broadcast %53 : f32 to vector<2x128xf32>
    %55 = arith.addf %44, %54 : vector<2x128xf32>
    %c0_37 = arith.constant 0 : index
    %c0_38 = arith.constant 0 : index
    %c0_39 = arith.constant 0 : index
    %c0_40 = arith.constant 0 : index
    %56 = vector.load %arg5[%c0_37, %c0_38, %c0_39, %c0_40] : memref<1x3x2x128xf32, #tpu.memory_space<vmem>>, vector<1x1x2x128xf32>
    %57 = vector.shape_cast %56 : vector<1x1x2x128xf32> to vector<2x128xf32>
    %58 = vector.shape_cast %55 : vector<2x128xf32> to vector<1x1x2x128xf32>
    tpu.vector_store %arg5[%c0_37, %c0_38, %c0_39, %c0_40], %58 {strides = array<i32>} : memref<1x3x2x128xf32, #tpu.memory_space<vmem>>, vector<1x1x2x128xf32>,
    %c1_41 = arith.constant 1 : index
    %59 = memref.load %arg4[%c1_41] : memref<3xf32, #tpu.memory_space<smem>>
    %60 = vector.broadcast %59 : f32 to vector<2x128xf32>
    %61 = arith.addf %48, %60 : vector<2x128xf32>
    %c0_42 = arith.constant 0 : index
    %c1_43 = arith.constant 1 : index
    %c0_44 = arith.constant 0 : index
    %c0_45 = arith.constant 0 : index
    %62 = vector.load %arg5[%c0_42, %c1_43, %c0_44, %c0_45] : memref<1x3x2x128xf32, #tpu.memory_space<vmem>>, vector<1x1x2x128xf32>
    %63 = vector.shape_cast %62 : vector<1x1x2x128xf32> to vector<2x128xf32>
    %64 = vector.shape_cast %61 : vector<2x128xf32> to vector<1x1x2x128xf32>
    tpu.vector_store %arg5[%c0_42, %c1_43, %c0_44, %c0_45], %64 {strides = array<i32>} : memref<1x3x2x128xf32, #tpu.memory_space<vmem>>, vector<1x1x2x128xf32>,
    %c2_46 = arith.constant 2 : index
    %65 = memref.load %arg4[%c2_46] : memref<3xf32, #tpu.memory_space<smem>>
    %66 = vector.broadcast %65 : f32 to vector<2x128xf32>
    %67 = arith.addf %52, %66 : vector<2x128xf32>
    %c0_47 = arith.constant 0 : index
    %c2_48 = arith.constant 2 : index
    %c0_49 = arith.constant 0 : index
    %c0_50 = arith.constant 0 : index
    %68 = vector.load %arg5[%c0_47, %c2_48, %c0_49, %c0_50] : memref<1x3x2x128xf32, #tpu.memory_space<vmem>>, vector<1x1x2x128xf32>
    %69 = vector.shape_cast %68 : vector<1x1x2x128xf32> to vector<2x128xf32>
    %70 = vector.shape_cast %67 : vector<2x128xf32> to vector<1x1x2x128xf32>
    tpu.vector_store %arg5[%c0_47, %c2_48, %c0_49, %c0_50], %70 {strides = array<i32>} : memref<1x3x2x128xf32, #tpu.memory_space<vmem>>, vector<1x1x2x128xf32>,
    return
  }
  func.func @transform_0(%arg0: i32, %arg1: i32) -> (i32, i32, i32, i32) {
    %c0_i32 = arith.constant 0 : i32
    %c0_i32_0 = arith.constant 0 : i32
    %c0_i32_1 = arith.constant 0 : i32
    return %arg0, %c0_i32, %arg1, %c0_i32_0 : i32, i32, i32, i32
  }
  func.func @transform_1(%arg0: i32, %arg1: i32) -> (i32, i32) {
    %c0_i32 = arith.constant 0 : i32
    %c0_i32_0 = arith.constant 0 : i32
    %c0_i32_1 = arith.constant 0 : i32
    return %c0_i32, %c0_i32_0 : i32, i32
  }
  func.func @transform_2(%arg0: i32, %arg1: i32) -> i32 {
    %c0_i32 = arith.constant 0 : i32
    %c0_i32_0 = arith.constant 0 : i32
    return %c0_i32 : i32
  }
  func.func @transform_3(%arg0: i32, %arg1: i32) -> (i32, i32, i32, i32) {
    %c0_i32 = arith.constant 0 : i32
    %c0_i32_0 = arith.constant 0 : i32
    %c0_i32_1 = arith.constant 0 : i32
    return %arg0, %c0_i32, %arg1, %c0_i32_0 : i32, i32, i32, i32
  }
}

</mosaic_0001>

<bundles_post_ra>
// kernel: tpu_custom_call.1
= control target key start
LH: loop header
LB: loop body
LE: loop exit
PB: predicated region body
PF: predicated region fallthrough
CT: control target
= control target key end

     0   :  { %8 = vsyncpa [#allocation3], 0  ;;  %s952_s0 = inlined_call_operand.hbm [shape: f32[2,4,2,128], index: 0, kind: input, shape index: {}]   ;;  %s953_s1 = inlined_call_operand.hbm [shape: f32[3,4], index: 1, kind: input, shape index: {}]   ;;  %s954_s2 = inlined_call_operand.vmem [shape: f32[3], index: 2, kind: input, shape index: {}]   ;;  %s955_s3 = inlined_call_operand.hbm [shape: f32[2,3,2,128], index: 3, kind: output, shape index: {}]  }
   0x1   :  { %10 = vsyncpa [#allocation3 + $0x1], 0 }
   0x2   :  { %11 = vsyncpa [#allocation5], 0 }
   0x3   :  { %12 = vsyncpa [#allocation6], 0 }
   0x4   :  { %13 = vsyncpa [#allocation4], 0 }
   0x5   :  { %15 = vsyncpa [#allocation4 + $0x1], 0  ;;  %s723_s12 = smov 0   ;;  %s725_s13 = smov 0  }
   0x6   :  { %s727_s14 = smov 0   ;;  %s729_s15 = smov 0  }
   0x7   :  { %s731_s16 = smov 0   ;;  %s733_s17 = smov 0  }
   0x8 LB: > { %s421_s18 = sadd.s32 4294967295, %s693_s17   ;;  %s422_s19 = sadd.s32 4294967294, %s693_s17   ;;  %s693_s17 = sphi %s733_s17, %s21_s17   ;;  %s689_s16 = sphi %s731_s16, %s976_s16   ;;  %s685_s15 = sphi %s729_s15, %s975_s15   ;;  %s681_s14 = sphi %s727_s14, %s974_s14   ;;  %s677_s13 = sphi %s725_s13, %s973_s13   ;;  %s673_s12 = sphi %s723_s12, %s972_s12  }
   0x9   : > { %s42_s20 = sadd.s32 1, %s681_s14  ;;  %p49_p0 = scmp.ne.s32.totalorder %s681_s14, %s677_s13 }
   0xa   : > { %p50_p1 = scmp.eq.s32.totalorder %s693_s17, 0  ;;  %p55_p2 = scmp.ne.s32.totalorder %s677_s13, %s673_s12 }
   0xb   : > { %p761_p3 = scmp.eq.s32.totalorder %s421_s18, 0  ;;  %p123_p4 = scmp.eq.s32.totalorder %s421_s18, 1 }
   0xc   : > { %p51_p5 = por %p50_p1, %p49_p0  ;;  %p129_p6 = scmp.eq.s32.totalorder %s422_s19, 1 }
   0xd   : > { %s960_s21 = scalar_select %p761_p3, 1, 0 }
   0xe   : > { %p767_p7 = por %p761_p3, %p55_p2  ;;  %p771_p8 = por %p123_p4, %p49_p0 }
   0xf   : > { %p775_p9 = por %p129_p6, %p55_p2  ;;  %p423_p10 = scmp.ge.s32.totalorder %s693_s17, 1 }
  0x10   : > { %s961_s22 = scalar_select %p767_p7, 1, 0 }
  0x11   : > { %s962_s23 = scalar_select %p771_p8, 1, 0 }
  0x12   : > { %s963_s24 = scalar_select %p775_p9, 1, 0 }
  0x13   : > { %p136_p11 = scmp.lt.s32.totalorder %s693_s17, 3  ;;  %p487_p1 = scmp.lt.s32.totalorder %s693_s17, 2 }
  0x14   : > { %s158_s28 = sshll.u32 %s954_s2, 4  ;;  %s169_s4 = sand.u32 1, %s681_s14   ;;  %s159_s28 = int_to_ptr.vmem [resolvable:$true] %s158_s28 }
  0x15   : > { %p782_p13 = pnand %p423_p10, %p136_p11  ;;  %p792_p4 = pnand %p487_p1, %p51_p5 }
  0x16   : > { %s33_s5 = sadd.s32 1, %s689_s16  ;;  %s545_s8 = scalar_lea.hbm %s953_s1, 64 }
  0x17   : > { %p470_p0 = pneg %p782_p13  ;;  %p546_p5 = scmp.ne.s32.totalorder %s953_s1, %s545_s8 }
  0x18   : > { %p552_p1 = scmp.lt.u32.totalorder %s545_s8, %s953_s1 }
  0x19   : > { %p798_p2 = pnand %p470_p0, %p761_p3 }
  0x1b   : > { %p547_p6 = pneg %p798_p2 }
  0x1d   : > { %p548_p10 = pnand %p547_p6, %p546_p5 }
  0x1f   : > { %p549_p11 = pneg %p548_p10 }
  0x21   : > { %p554_p0 = pnand %p552_p1, %p549_p11 }
  0x23   : > { %557 = shalt.err (!%p554_p0)
}
  0x24   : > { %s695_s19 = smov [#allocation7]   ;;  %s558_s6 = scalar_lea.vmem %s159_s28, 16 }
  0x25   : > { %473 = dma.hbm_to_smem (!%p798_p2), %s953_s1, 64, %s695_s19, [#allocation5]  }
  0x26   : > { %p559_p12 = scmp.ne.s32.totalorder %s159_s28, %s558_s6  ;;  %p566_p3 = scmp.lt.s32.totalorder %s159_s28, %s159_s28 }
  0x27   : > { %p567_p5 = scmp.lt.s32.totalorder %s558_s6, %s558_s6 }
  0x28   : > { %p561_p9 = pnand %p559_p12, %p547_p6 }
  0x29   : > { %p568_p10 = por %p567_p5, %p566_p3 }
  0x2a   : > { %p562_p8 = pneg %p561_p9 }
  0x2c   : > { %p569_p7 = pnand %p568_p10, %p562_p8 }
  0x2e   : > { %572 = shalt.err (!%p569_p7)
}
  0x2f   : > { %s696_s7 = smov [#allocation8]   ;;  %p35_p11 = scmp.ge.s32.totalorder %s33_s5, 2 }
  0x30   : > { %476 = dma.vmem_to_smem (!%p798_p2), %s159_s28, 16, %s696_s7, [#allocation6]  }
  0x31   : > { %s427_s8 = sshll.u32 %s169_s4, 3  ;;  %s455_s9 = sshll.u32 %s689_s16, 7 }
  0x32   : > { %s978_s5 = smov (%p35_p11, %s33_s5), 0  ;;  %s830_s30 = scalar_lea.hbm %s952_s0, %s455_s9 }
  0x33   : > { %s37_s18 = ssub.s32 %s689_s16, %s978_s5  ;;  %s173_s19 = scalar_lea.vmem [#allocation2], %s427_s8 }
  0x34   : > { %s181_s28 = sshll.u32 %s173_s19, 4  ;;  %p40_p3 = scmp.eq.s32.totalorder %s37_s18, 0  ;;  %s834_s28 = int_to_ptr.vmem [resolvable:$true] %s181_s28 }
  0x35   : > { %s843_s27 = scalar_lea.sflag [#allocation3], %s169_s4  ;;  %s573_s6 = scalar_lea.hbm %s830_s30, 128 }
  0x36   : > { %s839_s26 = scalar_select %p40_p3, %s681_s14, %s42_s20  }
  0x37   : > { %p574_p7 = scmp.ne.s32.totalorder %s830_s30, %s573_s6  ;;  %p575_p8 = pneg %p792_p4 }
  0x38   : > { %s578_s9 = scalar_lea.hbm %s952_s0, 256  ;;  %p579_p2 = scmp.lt.u32.totalorder %s830_s30, %s952_s0 }
  0x39   : > { %p576_p9 = pnand %p575_p8, %p574_p7  ;;  %p580_p6 = scmp.lt.u32.totalorder %s578_s9, %s573_s6 }
  0x3a   : > { %p582_p0 = scmp.lt.u32.totalorder %s573_s6, %s830_s30 }
  0x3b   : > { %p577_p12 = pneg %p576_p9  ;;  %p581_p1 = por %p580_p6, %p579_p2 }
  0x3d   : > { %p583_p5 = por %p582_p0, %p581_p1 }
  0x3f   : > { %p584_p10 = pnand %p583_p5, %p577_p12 }
  0x41   : > { %587 = shalt.err (!%p584_p10)
}
  0x42   : > { %s588_s20 = scalar_lea.vmem %s834_s28, 128  ;;  %s697_s4 = smov [#allocation2]  }
  0x43   : > { %p589_p11 = scmp.ne.s32.totalorder %s834_s28, %s588_s20  ;;  %s593_s18 = sshll.u32 %s697_s4, 4  ;;  %s594_s18 = int_to_ptr.vmem [resolvable:$false] %s593_s18 }
  0x44   : > { %s595_s19 = scalar_lea.vmem %s594_s18, 256  ;;  %p596_p9 = scmp.lt.s32.totalorder %s834_s28, %s594_s18 }
  0x45   : > { %p591_p3 = pnand %p589_p11, %p575_p8  ;;  %p597_p2 = scmp.lt.s32.totalorder %s595_s19, %s588_s20 }
  0x47   : > { %p592_p7 = pneg %p591_p3  ;;  %p598_p6 = por %p597_p2, %p596_p9 }
  0x49   : > { %p599_p1 = pnand %p598_p6, %p592_p7 }
  0x4b   : > { %602 = shalt.err (!%p599_p1)
}
  0x4c   : > { %s698_s6 = smov 32   ;;  %s699_s7 = smov 2  }
  0x4d   : > { %480 = dma.hbm_to_vmem [thread:$0]  (!%p792_p4), %s830_s30, 128, %s834_s28, %s843_s27, %s698_s6, %s698_s6, %s699_s7  }
  0x4e   : > { %193 = sbr.rel (%p782_p13) target bundleno = 131 (0x83), region = 32  ;;  %s874_s8 = sand.u32 (!%p782_p13), 1, %s677_s13  }
  0x4f   : > { %s431_s9 = sshll.u32 (!%p782_p13), %s874_s8, 3  ;;  %s196_s10 = scalar_lea.sflag (!%p782_p13), [#allocation3], %s874_s8 }
  0x50   : > { %s199_s11 = scalar_lea.vmem (!%p782_p13), [#allocation2], %s431_s9  ;;  %p967_p8 = scmp.ne.s32.totalorder (!%p782_p13), %s961_s22, 0 }
  0x55   : > { %656 = dma.done.wait (%p967_p8), %s196_s10, 128  }
  0x56   : > { %658 = vsyncadd (%p967_p8), %s196_s10, 4294967168  ;;  %p968_p12 = scmp.ne.s32.totalorder %s960_s21, 0 }
  0x58   : > { %660 = dma.done.wait (%p968_p12), [#allocation5], 64  }
  0x59   : > { %662 = vsyncadd (%p968_p12), [#allocation5], 4294967232 }
  0x5a   : > { %664 = dma.done.wait (%p968_p12), [#allocation6], 16  }
  0x5b   : > { %666 = vsyncadd (%p968_p12), [#allocation6], 4294967280 }
  0x5c   : > { %212 = sfence }
  0x5d   : > { %s232_s25 = sld [smem:[#allocation7]]  ;;  %s437_s29 = sld [smem:[#allocation7 + $0x1]]  ;;  %v231_v0 = vld [vmem:[%s199_s11] sm:$0x3]  ;;  %v436_v1 = vld [vmem:[%s199_s11 + $0x2] sm:$0x3] }
  0x5e   : > { %s441_s30 = sld [smem:[#allocation7 + $0x2]]  ;;  %s445_s28 = sld [smem:[#allocation7 + $0x3]]  ;;  %v440_v3 = vld [vmem:[%s199_s11 + $0x4] sm:$0x3]  ;;  %v444_v6 = vld [vmem:[%s199_s11 + $0x6] sm:$0x3] }
  0x5f   : > { %s434_s22 = sld [smem:[#allocation7 + $0x80]]  ;;  %s438_s20 = sld [smem:[#allocation7 + $0x81]] }
  0x60   : > { %s890_s27 = sld [smem:[#allocation8]]  ;;  %s442_s4 = sld [smem:[#allocation7 + $0x82]] }
  0x61   : > { %s446_s18 = sld [smem:[#allocation7 + $0x83]]  ;;  %s435_s21 = sld [smem:[#allocation7 + $0x100]] }
  0x62   : > { %s439_s19 = sld [smem:[#allocation7 + $0x101]]  ;;  %s443_s6 = sld [smem:[#allocation7 + $0x102]] }
  0x63   : > { %v233_v2 = vstv %s232_s25  ;;  %v244_v5 = vstv %s437_s29  ;;  %s892_s7 = sld [smem:[#allocation8 + $0x1]]  ;;  %s447_s9 = sld [smem:[#allocation7 + $0x103]] }
  0x64   : > { %v234_v4 = vmul.f32 %v233_v2, %v231_v0  ;;  %v245_v7 = vmul.f32 %v436_v1, %v244_v5  ;;  %v258_v8 = vstv %s441_s30  ;;  %v272_v10 = vstv %s445_s28  ;;  %s456_s10 = smul.u32 6, %s874_s8  ;;  %s450_s11 = sld [smem:[#allocation8 + $0x2]] }
  0x65   : > { %v259_v9 = vmul.f32 %v440_v3, %v258_v8  ;;  %v273_v12 = vmul.f32 %v444_v6, %v272_v10  ;;  %v236_v13 = vstv %s434_s22  ;;  %v248_v15 = vstv %s438_s20  ;;  %s457_s30 = smul.u32 96, %s685_s15  ;;  %s298_s20 = scalar_lea.sflag [#allocation4], %s874_s8 }
  0x66   : > { %v246_v11 = vadd.f32 %v245_v7, %v234_v4  ;;  %v237_v14 = vmul.f32 %v236_v13, %v231_v0  ;;  %v249_v17 = vmul.f32 %v436_v1, %v248_v15  ;;  %v262_v18 = vstv %s442_s4  ;;  %s230_s25 = scalar_lea.vmem [#allocation9], %s456_s10  ;;  %p969_p4 = scmp.ne.s32.totalorder %s962_s23, 0 }
  0x67   : > { %v276_v19 = vstv %s446_s18  ;;  %v284_v20 = vstv %s890_s27  ;;  %v263_v21 = vmul.f32 %v440_v3, %v262_v18  ;;  %v239_v23 = vstv %s435_s21  ;;  %s312_s29 = sshll.u32 %s230_s25, 4  ;;  %s903_s27 = scalar_lea.hbm %s955_s3, %s457_s30  ;;  %s898_s29 = int_to_ptr.vmem [resolvable:$true] %s312_s29 }
  0x68   : > { %v260_v16 = vadd.f32 %v259_v9, %v246_v11  ;;  %v277_v22 = vmul.f32 %v444_v6, %v276_v19  ;;  %v250_v25 = vadd.f32 %v249_v17, %v237_v14  ;;  %v240_v26 = vmul.f32 %v239_v23, %v231_v0  ;;  %s603_s4 = scalar_lea.vmem %s898_s29, 96  ;;  %s700_s15 = smov [#allocation9]  }
  0x69   : > { %v252_v27 = vstv %s439_s19  ;;  %v266_v29 = vstv %s443_s6  ;;  %v280_v30 = vstv %s447_s9  ;;  %v288_v34 = vstv %s892_s7  ;;  %p604_p13 = scmp.ne.s32.totalorder %s898_s29, %s603_s4  ;;  %s607_s18 = sshll.u32 %s700_s15, 4  ;;  %s608_s18 = int_to_ptr.vmem [resolvable:$false] %s607_s18 }
  0x6a   : > { %v274_v24 = vadd.f32 %v273_v12, %v260_v16  ;;  %v253_v28 = vmul.f32 %v436_v1, %v252_v27  ;;  %v264_v32 = vadd.f32 %v263_v21, %v250_v25  ;;  %v267_v33 = vmul.f32 %v440_v3, %v266_v29  ;;  %s609_s21 = scalar_lea.vmem %s608_s18, 192  ;;  %p610_p10 = scmp.lt.s32.totalorder %s898_s29, %s608_s18 }
  0x6b   : > { %v281_v36 = vmul.f32 %v444_v6, %v280_v30  ;;  %v293_v40 = vstv %s450_s11  ;;  %p605_p0 = pnand %p604_p13, %p969_p4  ;;  %p611_p11 = scmp.lt.s32.totalorder %s609_s21, %s603_s4 }
  0x6c   : > { %v285_v31 = vadd.f32 %v284_v20, %v274_v24  ;;  %v254_v35 = vadd.f32 %v253_v28, %v240_v26  ;;  %v278_v37 = vadd.f32 %v277_v22, %v264_v32 }
  0x6d   : > { %p606_p5 = pneg %p605_p0  ;;  %p612_p3 = por %p611_p11, %p610_p10 }
  0x6e   : > { %286 = vst [vmem:[%s230_s25] sm:$0x3] %v285_v31  ;;  %v268_v38 = vadd.f32 %v267_v33, %v254_v35  ;;  %v289_v39 = vadd.f32 %v288_v34, %v278_v37 }
  0x6f   : > { %p613_p7 = pnand %p612_p3, %p606_p5 }
  0x70   : > { %v282_v41 = vadd.f32 %v281_v36, %v268_v38  ;;  %449 = vst [vmem:[%s230_s25 + $0x2] sm:$0x3] %v289_v39 }
  0x72   : > { %v294_v42 = vadd.f32 %v293_v40, %v282_v41 }
  0x74   : > { %451 = vst [vmem:[%s230_s25 + $0x4] sm:$0x3] %v294_v42 }
  0x75   : > { %616 = shalt.err (!%p613_p7)
}
  0x76   : > { %s617_s19 = scalar_lea.hbm %s903_s27, 96  ;;  %s621_s9 = scalar_lea.hbm %s955_s3, 192 }
  0x77   : > { %p618_p9 = scmp.ne.s32.totalorder %s903_s27, %s617_s19  ;;  %p622_p1 = scmp.lt.u32.totalorder %s903_s27, %s955_s3 }
  0x78   : > { %p623_p8 = scmp.lt.u32.totalorder %s621_s9, %s617_s19  ;;  %p625_p13 = scmp.lt.u32.totalorder %s617_s19, %s903_s27 }
  0x79   : > { %p619_p2 = pnand %p618_p9, %p969_p4 }
  0x7a   : > { %p624_p12 = por %p623_p8, %p622_p1 }
  0x7b   : > { %p620_p6 = pneg %p619_p2 }
  0x7c   : > { %p626_p0 = por %p625_p13, %p624_p12 }
  0x7e   : > { %p627_p5 = pnand %p626_p0, %p620_p6 }
  0x80   : > { %630 = shalt.err (!%p627_p5)
}
  0x81   : > { %s701_s25 = smov 32   ;;  %s702_s30 = smov 2  }
  0x82   : > { %468 = dma.vmem_to_hbm [thread:$0]  (%p969_p4), %s898_s29, 96, %s903_s27, %s298_s20, %s701_s25, %s701_s25, %s702_s30  }
  0x83 PF: > { %s327_s28 = sand.u32 1, %s673_s12   ;;  %p970_p10 = scmp.ne.s32.totalorder %s963_s24, 0 }
  0x84   : > { %p971_p11 = scmp.ge.s32.totalorder %s693_s17, 2  ;;  %s328_s22 = scalar_lea.sflag [#allocation4], %s327_s28 }
  0x86   : > { %p482_p3 = pnand %p971_p11, %p970_p10 }
  0x88   : > { %668 = dma.done.wait (!%p482_p3), %s328_s22, 96  }
  0x89   : > { %670 = vsyncadd (!%p482_p3), %s328_s22, 4294967200  ;;  %s21_s17 = sadd.s32 1, %s693_s17   ;;  %s972_s12 = smov %s677_s13 }
  0x8a   : > { %p18_p7 = scmp.ge.s32.totalorder %s21_s17, 4   ;;  %s973_s13 = smov %s681_s14 }
  0x8b   : > { %s974_s14 = smov %s839_s26  ;;  %s975_s15 = smov %s689_s16 }
  0x8c   : > { %s976_s16 = smov %s978_s5  ;;  %20 = sbr.rel (!%p18_p7) target bundleno = 8 (0x8), region = 92 }
  0x93   :  { %333 = vsyncpa [#allocation3], 1 }
  0x94   :  { %335 = vsyncpa [#allocation3 + $0x1], 1 }
  0x95   :  { %336 = vsyncpa [#allocation4], 1 }
  0x96   :  { %338 = vsyncpa [#allocation4 + $0x1], 1 }
  0x97   :  { %339 = vsyncpa [#allocation5], 1 }
  0x98   :  { %341 = vsyncpa [#allocation5 + $0x1], 1 }
  0x99   :  { %342 = vsyncpa [#allocation6], 1 }
  0x9a   :  { %344 = vsyncpa [#allocation6 + $0x1], 1 }

</bundles_post_ra>
